<compile_context>
chip_gen: v7x
topology: tpu7x:2x2x1
jax: 0.10.0
libtpu: 0.0.40
codegen_flags: <defaults>
</compile_context>

<pallas_src>
import functools

import jax
import jax.numpy as jnp
from jax.experimental import pallas as pl
from jax.experimental.pallas import tpu as pltpu

Nlayers = 6
dropout = 0.0  # p == 0.0 -> identity; nothing to do in-kernel.
# TODO(synk): training-mode dropout (p > 0) would need pltpu.prng_* masks.

_LANE = 128


def _round_up(n, m):
    return ((n + m - 1) // m) * m


def _pad2(a, rows, cols):
    return jnp.pad(a, ((0, rows - a.shape[0]), (0, cols - a.shape[1])))


def _device_kind():
    try:
        return jax.devices()[0].device_kind.lower()
    except Exception:  # pragma: no cover - defensive, e.g. no devices yet
        return ""


def _is_v5e(kind):
    return ("v5e" in kind) or ("v5 lite" in kind) or ("v5lite" in kind)


def _is_v7(kind):
    return "v7" in kind


def _pick_tb(batch, block_batch):
    """Batch tile: multiple of 16 (bf16 sublane packing), sized to limit the
    number of fully-computed padding rows for ragged batches."""
    b16 = _round_up(batch, 16)
    if b16 <= block_batch:
        return b16
    best, best_pad = block_batch, _round_up(batch, block_batch) - batch
    cand = block_batch - 16
    while cand >= 64:  # keep tiles reasonably large for pipelining
        pad = _round_up(batch, cand) - batch
        if pad < best_pad:
            best, best_pad = cand, pad
        cand -= 16
    return best


# ---------------------------------------------------------------------------
# Kernel
# ---------------------------------------------------------------------------
def feedforward_kernel(x_ref, w1_ref, b1_ref, w2_ref, b2_ref, w3_ref, b3_ref,
                       out_ref):
    # fc1 + relu  (bf16 operands, f32 accumulation on the MXU)
    h = jnp.dot(x_ref[...], w1_ref[...], preferred_element_type=jnp.float32)
    h = jnp.maximum(h + b1_ref[...], 0.0)

    # Hoist the shared middle-layer weight load AND the bias broadcast out of
    # the unrolled loop (JAX does not CSE per-iteration loads / broadcasts).
    w2 = w2_ref[...]
    b2 = jnp.broadcast_to(b2_ref[...], h.shape)
    # TODO(synk): at large Nlayers switch to lax.fori_loop(..., unroll=True) to
    # bound live ranges; at Nlayers=6 a static unroll is fine.
    for _ in range(Nlayers - 1):
        h = jnp.dot(h.astype(w2.dtype), w2, preferred_element_type=jnp.float32)
        h = jnp.maximum(h + b2, 0.0)

    # fc3 (no activation)
    out = jnp.dot(h.astype(w3_ref.dtype), w3_ref[...],
                  preferred_element_type=jnp.float32)
    out_ref[...] = (out + b3_ref[...]).astype(out_ref.dtype)


# ---------------------------------------------------------------------------
# One-time parameter preparation (pad + bf16 cast) -- NOT in the per-call path.
# ---------------------------------------------------------------------------
def prepare_params(w1, b1, w2, b2, w3, b3):
    """Weights stored [in, out]; biases [1, out]. Pads feature dims so every
    vreg / store is lane-dense (zero padding is exactly semantics-preserving:
    padded hidden lanes stay 0 through relu and zero weight rows/cols)."""
    kind = _device_kind()
    feat_align = _LANE if _is_v5e(kind) else 256  # full-width MXU on v6e/v7x

    in_size, hidden_size = w1.shape
    output_size = w3.shape[1]
    in_p = _round_up(in_size, _LANE)
    hid_p = _round_up(hidden_size, feat_align)
    out_p = _round_up(output_size, feat_align)

    params = {
        "w1": _pad2(w1, in_p, hid_p).astype(jnp.bfloat16),
        "b1": _pad2(b1, 1, hid_p).astype(jnp.float32),
        "w2": _pad2(w2, hid_p, hid_p).astype(jnp.bfloat16),
        "b2": _pad2(b2, 1, hid_p).astype(jnp.float32),
        "w3": _pad2(w3, hid_p, out_p).astype(jnp.bfloat16),
        "b3": _pad2(b3, 1, out_p).astype(jnp.float32),
    }
    params = jax.tree_util.tree_map(jnp.asarray, params)
    return params, output_size


# ---------------------------------------------------------------------------
# Per-call forward
# ---------------------------------------------------------------------------
@functools.partial(jax.jit,
                   static_argnames=("output_size", "block_batch", "out_dtype"))
def feedforward(x, params, *, output_size, block_batch=None,
                out_dtype=jnp.float32):
    """x: [B, input_size] (unpadded). params: output of prepare_params."""
    kind = _device_kind()
    if block_batch is None:
        # v5e MXUs are 128-wide: M=256 gains nothing but doubles working set.
        block_batch = 128 if _is_v5e(kind) else 256

    B, in_size = x.shape
    in_p, hid_p = params["w1"].shape
    out_p = params["w3"].shape[1]

    tb = _pick_tb(B, block_batch)
    b_p = _round_up(B, tb)
    grid_steps = b_p // tb

    # x padding / cast (batch-dependent, so it stays in the per-call path).
    xp = _pad2(x, b_p, in_p).astype(jnp.bfloat16)

    out_itemsize = jnp.dtype(out_dtype).itemsize
    weight_bytes = ((params["w1"].size + params["w2"].size
                     + params["w3"].size) * 2
                    + (params["b1"].size + params["b2"].size
                       + params["b3"].size) * 4)
    act_bytes = (2 * tb * in_p * 2            # double-buffered x tile (bf16)
                 + 2 * tb * out_p * out_itemsize  # double-buffered out tile
                 + 3 * tb * hid_p * 4)        # live f32 activation copies
    vmem_budget = (48 << 20) if _is_v7(kind) else (100 << 20)
    if weight_bytes + act_bytes > vmem_budget:
        # TODO(synk): fall back to a 2-D grid that tiles w2's N (or K with an
        # f32 accumulator scratch) instead of keeping all weights resident.
        raise ValueError(
            f"Resident weights + working set ({weight_bytes + act_bytes} B) "
            f"exceed the VMEM budget ({vmem_budget} B) on '{kind}'.")

    # Weights/biases: constant index_map across the grid -> single-buffered
    # (the second pipeline buffer would be pure VMEM waste).
    def _resident(shape):
        return pl.BlockSpec(shape, lambda i: (0,) * len(shape),
                            pipeline_mode=pl.Buffered(1))

    # Megacore: on v7x shard the batch axis across the 2 TensorCores.
    if _is_v7(kind) and grid_steps >= 2:
        dim_sem = (pltpu.CORE_PARALLEL,)
    else:
        dim_sem = ("parallel",)

    flops = 2 * b_p * (in_p * hid_p + (Nlayers - 1) * hid_p * hid_p
                       + hid_p * out_p)
    bytes_accessed = (xp.size * 2 + weight_bytes + b_p * out_p * out_itemsize)

    out_padded = pl.pallas_call(
        feedforward_kernel,
        out_shape=jax.ShapeDtypeStruct((b_p, out_p), out_dtype),
        grid=(grid_steps,),
        in_specs=[
            pl.BlockSpec((tb, in_p), lambda i: (i, 0)),   # x: batch-tiled
            _resident((in_p, hid_p)),                     # w1 (VMEM resident)
            _resident((1, hid_p)),                        # b1
            _resident((hid_p, hid_p)),                    # w2 (shared layer)
            _resident((1, hid_p)),                        # b2
            _resident((hid_p, out_p)),                    # w3
            _resident((1, out_p)),                        # b3
        ],
        out_specs=pl.BlockSpec((tb, out_p), lambda i: (i, 0)),
        compiler_params=pltpu.CompilerParams(
            dimension_semantics=dim_sem,
            vmem_limit_bytes=vmem_budget),
        cost_estimate=pl.CostEstimate(
            flops=flops, transcendentals=0, bytes_accessed=bytes_accessed),
    )(xp, params["w1"], params["b1"], params["w2"], params["b2"],
      params["w3"], params["b3"])

    return out_padded[:B, :output_size].astype(jnp.float32)


# ---------------------------------------------------------------------------
# Reference + demo
# ---------------------------------------------------------------------------
def _init_linear(key, fan_in, fan_out):
    # Deterministic init mimicking PyTorch nn.Linear default:
    # U(-1/sqrt(fan_in), +1/sqrt(fan_in)); weight stored pre-transposed [in, out].
    kw, kb = jax.random.split(key)
    bound = 1.0 / jnp.sqrt(jnp.float32(fan_in))
    w = jax.random.uniform(kw, (fan_in, fan_out), jnp.float32, -bound, bound)
    b = jax.random.uniform(kb, (1, fan_out), jnp.float32, -bound, bound)
    return w, b


def reference_forward(x, w1, b1, w2, b2, w3, b3):
    # Pure-JAX reference with the same bf16-operand / f32-accumulate recipe.
    bf = jnp.bfloat16
    h = jnp.dot(x.astype(bf), w1.astype(bf), preferred_element_type=jnp.float32)
    h = jnp.maximum(h + b1, 0.0)
    for _ in range(Nlayers - 1):
        h = jnp.dot(h.astype(bf), w2.astype(bf),
                    preferred_element_type=jnp.float32)
        h = jnp.maximum(h + b2, 0.0)
    return jnp.dot(h.astype(bf), w3.astype(bf),
                   preferred_element_type=jnp.float32) + b3


if __name__ == "__main__":
    batch = 8
    input_size = 16
    hidden_size = 32
    output_size = 8

    key = jax.random.PRNGKey(0)
    kx, k1, k2, k3 = jax.random.split(key, 4)

    x = jax.random.normal(kx, (batch, input_size), jnp.float32)
    w1, b1 = _init_linear(k1, input_size, hidden_size)
    w2, b2 = _init_linear(k2, hidden_size, hidden_size)
    w3, b3 = _init_linear(k3, hidden_size, output_size)

    # One-time (model-init) weight padding / bf16 cast.
    params, out_size = prepare_params(w1, b1, w2, b2, w3, b3)
    params = jax.block_until_ready(params)

    out = feedforward(x, params, output_size=out_size)
    out = jax.block_until_ready(out)

    ref = reference_forward(x, w1, b1, w2, b2, w3, b3)
    assert out.shape == (batch, output_size)
    assert jnp.allclose(out, ref, atol=1e-2, rtol=1e-2), float(
        jnp.max(jnp.abs(out - ref)))

    print("KERNEL_OK")
</pallas_src>

<mosaic_0001>
module attributes {stable_mosaic.version = 11 : i64} {
  func.func @feedforward_kernel(%arg0: i32, %arg1: memref<16x128xbf16, #tpu.memory_space<vmem>>, %arg2: memref<128x256xbf16, #tpu.memory_space<vmem>>, %arg3: memref<1x256xf32, #tpu.memory_space<vmem>>, %arg4: memref<256x256xbf16, #tpu.memory_space<vmem>>, %arg5: memref<1x256xf32, #tpu.memory_space<vmem>>, %arg6: memref<256x256xbf16, #tpu.memory_space<vmem>>, %arg7: memref<1x256xf32, #tpu.memory_space<vmem>>, %arg8: memref<16x256xf32, #tpu.memory_space<vmem>>) attributes {dimension_semantics = [#tpu.dimension_semantics<parallel>], iteration_bounds = array<i64: 1>, scalar_prefetch = 0 : i64, scratch_operands = 0 : i64, tpu.core_type = #tpu.core_type<tc>, window_params = [{transform_indices = @transform_0, window_bounds = array<i64: 16, 128>}, {pipeline_mode = #tpu.pipeline_mode<synchronous>, transform_indices = @transform_1, window_bounds = array<i64: 128, 256>}, {pipeline_mode = #tpu.pipeline_mode<synchronous>, transform_indices = @transform_2, window_bounds = array<i64: 1, 256>}, {pipeline_mode = #tpu.pipeline_mode<synchronous>, transform_indices = @transform_3, window_bounds = array<i64: 256, 256>}, {pipeline_mode = #tpu.pipeline_mode<synchronous>, transform_indices = @transform_4, window_bounds = array<i64: 1, 256>}, {pipeline_mode = #tpu.pipeline_mode<synchronous>, transform_indices = @transform_5, window_bounds = array<i64: 256, 256>}, {pipeline_mode = #tpu.pipeline_mode<synchronous>, transform_indices = @transform_6, window_bounds = array<i64: 1, 256>}, {transform_indices = @transform_7, window_bounds = array<i64: 16, 256>}]} {
    %c0 = arith.constant 0 : index
    %c0_0 = arith.constant 0 : index
    %0 = vector.load %arg1[%c0, %c0_0] : memref<16x128xbf16, #tpu.memory_space<vmem>>, vector<16x128xbf16>
    %c0_1 = arith.constant 0 : index
    %c0_2 = arith.constant 0 : index
    %1 = vector.load %arg2[%c0_1, %c0_2] : memref<128x256xbf16, #tpu.memory_space<vmem>>, vector<128x256xbf16>
    %cst = arith.constant dense<0.000000e+00> : vector<16x256xf32>
    %2 = tpu.matmul %0, %1, %cst {dimension_numbers = #tpu.dot_dimension_numbers<[1], [0], [0], [1], [0, 0, 1, 1], [], []>} : vector<16x128xbf16>, vector<128x256xbf16>, vector<16x256xf32> -> vector<16x256xf32>
    %c0_3 = arith.constant 0 : index
    %c0_4 = arith.constant 0 : index
    %3 = vector.load %arg3[%c0_3, %c0_4] : memref<1x256xf32, #tpu.memory_space<vmem>>, vector<1x256xf32>
    %4 = vector.broadcast %3 : vector<1x256xf32> to vector<16x256xf32>
    %5 = arith.addf %2, %4 : vector<16x256xf32>
    %cst_5 = arith.constant 0.000000e+00 : f32
    %6 = vector.broadcast %cst_5 : f32 to vector<16x256xf32>
    %7 = arith.maximumf %5, %6 : vector<16x256xf32>
    %c0_6 = arith.constant 0 : index
    %c0_7 = arith.constant 0 : index
    %8 = vector.load %arg4[%c0_6, %c0_7] : memref<256x256xbf16, #tpu.memory_space<vmem>>, vector<256x256xbf16>
    %c0_8 = arith.constant 0 : index
    %c0_9 = arith.constant 0 : index
    %9 = vector.load %arg5[%c0_8, %c0_9] : memref<1x256xf32, #tpu.memory_space<vmem>>, vector<1x256xf32>
    %10 = vector.shape_cast %9 : vector<1x256xf32> to vector<1x256xf32>
    %11 = vector.broadcast %10 : vector<1x256xf32> to vector<16x256xf32>
    %12 = arith.truncf %7 : vector<16x256xf32> to vector<16x256xbf16>
    %cst_10 = arith.constant dense<0.000000e+00> : vector<16x256xf32>
    %13 = tpu.matmul %12, %8, %cst_10 {dimension_numbers = #tpu.dot_dimension_numbers<[1], [0], [0], [1], [0, 0, 1, 1], [], []>} : vector<16x256xbf16>, vector<256x256xbf16>, vector<16x256xf32> -> vector<16x256xf32>
    %14 = arith.addf %13, %11 : vector<16x256xf32>
    %cst_11 = arith.constant 0.000000e+00 : f32
    %15 = vector.broadcast %cst_11 : f32 to vector<16x256xf32>
    %16 = arith.maximumf %14, %15 : vector<16x256xf32>
    %17 = arith.truncf %16 : vector<16x256xf32> to vector<16x256xbf16>
    %cst_12 = arith.constant dense<0.000000e+00> : vector<16x256xf32>
    %18 = tpu.matmul %17, %8, %cst_12 {dimension_numbers = #tpu.dot_dimension_numbers<[1], [0], [0], [1], [0, 0, 1, 1], [], []>} : vector<16x256xbf16>, vector<256x256xbf16>, vector<16x256xf32> -> vector<16x256xf32>
    %19 = arith.addf %18, %11 : vector<16x256xf32>
    %cst_13 = arith.constant 0.000000e+00 : f32
    %20 = vector.broadcast %cst_13 : f32 to vector<16x256xf32>
    %21 = arith.maximumf %19, %20 : vector<16x256xf32>
    %22 = arith.truncf %21 : vector<16x256xf32> to vector<16x256xbf16>
    %cst_14 = arith.constant dense<0.000000e+00> : vector<16x256xf32>
    %23 = tpu.matmul %22, %8, %cst_14 {dimension_numbers = #tpu.dot_dimension_numbers<[1], [0], [0], [1], [0, 0, 1, 1], [], []>} : vector<16x256xbf16>, vector<256x256xbf16>, vector<16x256xf32> -> vector<16x256xf32>
    %24 = arith.addf %23, %11 : vector<16x256xf32>
    %cst_15 = arith.constant 0.000000e+00 : f32
    %25 = vector.broadcast %cst_15 : f32 to vector<16x256xf32>
    %26 = arith.maximumf %24, %25 : vector<16x256xf32>
    %27 = arith.truncf %26 : vector<16x256xf32> to vector<16x256xbf16>
    %cst_16 = arith.constant dense<0.000000e+00> : vector<16x256xf32>
    %28 = tpu.matmul %27, %8, %cst_16 {dimension_numbers = #tpu.dot_dimension_numbers<[1], [0], [0], [1], [0, 0, 1, 1], [], []>} : vector<16x256xbf16>, vector<256x256xbf16>, vector<16x256xf32> -> vector<16x256xf32>
    %29 = arith.addf %28, %11 : vector<16x256xf32>
    %cst_17 = arith.constant 0.000000e+00 : f32
    %30 = vector.broadcast %cst_17 : f32 to vector<16x256xf32>
    %31 = arith.maximumf %29, %30 : vector<16x256xf32>
    %32 = arith.truncf %31 : vector<16x256xf32> to vector<16x256xbf16>
    %cst_18 = arith.constant dense<0.000000e+00> : vector<16x256xf32>
    %33 = tpu.matmul %32, %8, %cst_18 {dimension_numbers = #tpu.dot_dimension_numbers<[1], [0], [0], [1], [0, 0, 1, 1], [], []>} : vector<16x256xbf16>, vector<256x256xbf16>, vector<16x256xf32> -> vector<16x256xf32>
    %34 = arith.addf %33, %11 : vector<16x256xf32>
    %cst_19 = arith.constant 0.000000e+00 : f32
    %35 = vector.broadcast %cst_19 : f32 to vector<16x256xf32>
    %36 = arith.maximumf %34, %35 : vector<16x256xf32>
    %37 = arith.truncf %36 : vector<16x256xf32> to vector<16x256xbf16>
    %c0_20 = arith.constant 0 : index
    %c0_21 = arith.constant 0 : index
    %38 = vector.load %arg6[%c0_20, %c0_21] : memref<256x256xbf16, #tpu.memory_space<vmem>>, vector<256x256xbf16>
    %cst_22 = arith.constant dense<0.000000e+00> : vector<16x256xf32>
    %39 = tpu.matmul %37, %38, %cst_22 {dimension_numbers = #tpu.dot_dimension_numbers<[1], [0], [0], [1], [0, 0, 1, 1], [], []>} : vector<16x256xbf16>, vector<256x256xbf16>, vector<16x256xf32> -> vector<16x256xf32>
    %c0_23 = arith.constant 0 : index
    %c0_24 = arith.constant 0 : index
    %40 = vector.load %arg7[%c0_23, %c0_24] : memref<1x256xf32, #tpu.memory_space<vmem>>, vector<1x256xf32>
    %41 = vector.broadcast %40 : vector<1x256xf32> to vector<16x256xf32>
    %42 = arith.addf %39, %41 : vector<16x256xf32>
    %c0_25 = arith.constant 0 : index
    %c0_26 = arith.constant 0 : index
    %43 = vector.load %arg8[%c0_25, %c0_26] : memref<16x256xf32, #tpu.memory_space<vmem>>, vector<16x256xf32>
    tpu.vector_store %arg8[%c0_25, %c0_26], %42 {strides = array<i32>} : memref<16x256xf32, #tpu.memory_space<vmem>>, vector<16x256xf32>,
    return
  }
  func.func @transform_0(%arg0: i32) -> (i32, i32) {
    %c0_i32 = arith.constant 0 : i32
    %c0_i32_0 = arith.constant 0 : i32
    return %arg0, %c0_i32 : i32, i32
  }
  func.func @transform_1(%arg0: i32) -> (i32, i32) {
    %c0_i32 = arith.constant 0 : i32
    %c0_i32_0 = arith.constant 0 : i32
    %c0_i32_1 = arith.constant 0 : i32
    return %c0_i32, %c0_i32_0 : i32, i32
  }
  func.func @transform_2(%arg0: i32) -> (i32, i32) {
    %c0_i32 = arith.constant 0 : i32
    %c0_i32_0 = arith.constant 0 : i32
    %c0_i32_1 = arith.constant 0 : i32
    return %c0_i32, %c0_i32_0 : i32, i32
  }
  func.func @transform_3(%arg0: i32) -> (i32, i32) {
    %c0_i32 = arith.constant 0 : i32
    %c0_i32_0 = arith.constant 0 : i32
    %c0_i32_1 = arith.constant 0 : i32
    return %c0_i32, %c0_i32_0 : i32, i32
  }
  func.func @transform_4(%arg0: i32) -> (i32, i32) {
    %c0_i32 = arith.constant 0 : i32
    %c0_i32_0 = arith.constant 0 : i32
    %c0_i32_1 = arith.constant 0 : i32
    return %c0_i32, %c0_i32_0 : i32, i32
  }
  func.func @transform_5(%arg0: i32) -> (i32, i32) {
    %c0_i32 = arith.constant 0 : i32
    %c0_i32_0 = arith.constant 0 : i32
    %c0_i32_1 = arith.constant 0 : i32
    return %c0_i32, %c0_i32_0 : i32, i32
  }
  func.func @transform_6(%arg0: i32) -> (i32, i32) {
    %c0_i32 = arith.constant 0 : i32
    %c0_i32_0 = arith.constant 0 : i32
    %c0_i32_1 = arith.constant 0 : i32
    return %c0_i32, %c0_i32_0 : i32, i32
  }
  func.func @transform_7(%arg0: i32) -> (i32, i32) {
    %c0_i32 = arith.constant 0 : i32
    %c0_i32_0 = arith.constant 0 : i32
    return %arg0, %c0_i32 : i32, i32
  }
}

</mosaic_0001>

<bundles_post_ra>
// kernel: feedforward.1
= control target key start
LH: loop header
LB: loop body
LE: loop exit
PB: predicated region body
PF: predicated region fallthrough
CT: control target
= control target key end

     0   :  { %12 = vsyncpa [#allocation3], 0  ;;  %s1823_s0 = inlined_call_operand.hbm [shape: bf16[16,128], index: 0, kind: input, shape index: {}]   ;;  %s1824_s1 = inlined_call_operand.hbm [shape: bf16[128,256], index: 1, kind: input, shape index: {}]   ;;  %s1825_s2 = inlined_call_operand.hbm [shape: f32[1,256], index: 2, kind: input, shape index: {}]   ;;  %s1826_s3 = inlined_call_operand.hbm [shape: bf16[256,256], index: 3, kind: input, shape index: {}]   ;;  %s1827_s4 = inlined_call_operand.hbm [shape: f32[1,256], index: 4, kind: input, shape index: {}]   ;;  %s1828_s5 = inlined_call_operand.hbm [shape: bf16[256,256], index: 5, kind: input, shape index: {}]   ;;  %s1829_s6 = inlined_call_operand.hbm [shape: f32[1,256], index: 6, kind: input, shape index: {}]   ;;  %s1830_s7 = inlined_call_operand.hbm [shape: f32[16,256], index: 7, kind: output, shape index: {}]  }
   0x1   :  { %13 = vsyncpa [#allocation6], 0 }
   0x2   :  { %14 = vsyncpa [#allocation9], 0 }
   0x3   :  { %15 = vsyncpa [#allocation12], 0 }
   0x4   :  { %16 = vsyncpa [#allocation4], 0  ;;  %s1405_s24 = smov [#allocation5]   ;;  %s1219_s28 = scalar_lea.hbm %s1824_s1, 2048 }
   0x5   :  { %s34_s25 = sshll.u32 %s1405_s24, 4  ;;  %p1220_p0 = scmp.ne.s32.totalorder %s1824_s1, %s1219_s28  ;;  %s35_s25 = int_to_ptr.vmem [resolvable:$true] %s34_s25 }
   0x6   :  { %p1223_p1 = scmp.lt.u32.totalorder %s1219_s28, %s1824_s1 }
   0x8   :  { %p1225_p2 = pnand %p1223_p1, %p1220_p0 }
   0xa   :  { %1228 = shalt.err (!%p1225_p2)
}
   0xb   :  { %s1229_s10 = scalar_lea.vmem %s35_s25, 2048  ;;  %p1234_p4 = scmp.lt.s32.totalorder %s35_s25, %s35_s25 }
   0xc   :  { %p1230_p3 = scmp.ne.s32.totalorder %s35_s25, %s1229_s10  ;;  %p1235_p5 = scmp.lt.s32.totalorder %s1229_s10, %s1229_s10 }
   0xe   :  { %p1236_p6 = por %p1235_p5, %p1234_p4 }
  0x10   :  { %p1237_p7 = pnand %p1236_p6, %p1230_p3 }
  0x12   :  { %1240 = shalt.err (!%p1237_p7)
}
  0x13   :  { %s1406_s11 = smov 128   ;;  %s1407_s12 = smov 8  }
  0x14   :  { %40 = dma.hbm_to_vmem [thread:$0]  %s1824_s1, 2048, %s35_s25, [#allocation6], %s1406_s11, %s1406_s11, %s1407_s12  }
  0x15   :  { %s1408_s15 = smov [#allocation8]   ;;  %s1409_s17 = smov [#allocation11]  }
  0x16   :  { %s56_s16 = sshll.u32 %s1408_s15, 4  ;;  %s78_s18 = sshll.u32 %s1409_s17, 4  ;;  %s57_s16 = int_to_ptr.vmem [resolvable:$true] %s56_s16  ;;  %s79_s18 = int_to_ptr.vmem [resolvable:$true] %s78_s18 }
  0x17   :  { %s1241_s21 = scalar_lea.hbm %s1826_s3, 4096 }
  0x18   :  { %p1242_p8 = scmp.ne.s32.totalorder %s1826_s3, %s1241_s21  ;;  %p1245_p9 = scmp.lt.u32.totalorder %s1241_s21, %s1826_s3 }
  0x1a   :  { %p1247_p10 = pnand %p1245_p9, %p1242_p8 }
  0x1c   :  { %1250 = shalt.err (!%p1247_p10)
}
  0x1d   :  { %s1251_s1 = scalar_lea.vmem %s57_s16, 4096  ;;  %p1256_p12 = scmp.lt.s32.totalorder %s57_s16, %s57_s16 }
  0x1e   :  { %p1252_p11 = scmp.ne.s32.totalorder %s57_s16, %s1251_s1  ;;  %p1257_p13 = scmp.lt.s32.totalorder %s1251_s1, %s1251_s1 }
  0x20   :  { %p1258_p0 = por %p1257_p13, %p1256_p12 }
  0x22   :  { %p1259_p1 = pnand %p1258_p0, %p1252_p11 }
  0x24   :  { %1262 = shalt.err (!%p1259_p1)
}
  0x25   :  { %62 = dma.hbm_to_vmem [thread:$0]  %s1826_s3, 4096, %s57_s16, [#allocation9], %s1406_s11, %s1406_s11, %s1407_s12  }
  0x26   :  { %s1263_s30 = scalar_lea.hbm %s1828_s5, 4096 }
  0x27   :  { %p1264_p2 = scmp.ne.s32.totalorder %s1828_s5, %s1263_s30  ;;  %p1267_p3 = scmp.lt.u32.totalorder %s1263_s30, %s1828_s5 }
  0x29   :  { %p1269_p4 = pnand %p1267_p3, %p1264_p2 }
  0x2b   :  { %1272 = shalt.err (!%p1269_p4)
}
  0x2c   :  { %s1273_s14 = scalar_lea.vmem %s79_s18, 4096  ;;  %p1278_p6 = scmp.lt.s32.totalorder %s79_s18, %s79_s18 }
  0x2d   :  { %p1274_p5 = scmp.ne.s32.totalorder %s79_s18, %s1273_s14  ;;  %p1279_p7 = scmp.lt.s32.totalorder %s1273_s14, %s1273_s14 }
  0x2f   :  { %p1280_p8 = por %p1279_p7, %p1278_p6 }
  0x31   :  { %p1281_p9 = pnand %p1280_p8, %p1274_p5 }
  0x33   :  { %1284 = shalt.err (!%p1281_p9)
}
  0x34   :  { %84 = dma.hbm_to_vmem [thread:$0]  %s1828_s5, 4096, %s79_s18, [#allocation12], %s1406_s11, %s1406_s11, %s1407_s12  }
  0x35   :  { %s1410_s16 = smov [#allocation2]   ;;  %s1285_s21 = scalar_lea.hbm %s1823_s0, 128 }
  0x36   :  { %s22_s17 = sshll.u32 %s1410_s16, 4  ;;  %p1286_p10 = scmp.ne.s32.totalorder %s1823_s0, %s1285_s21  ;;  %s23_s17 = int_to_ptr.vmem [resolvable:$true] %s22_s17 }
  0x37   :  { %p1289_p11 = scmp.lt.u32.totalorder %s1285_s21, %s1823_s0 }
  0x39   :  { %p1291_p12 = pnand %p1289_p11, %p1286_p10 }
  0x3b   :  { %1294 = shalt.err (!%p1291_p12)
}
  0x3c   :  { %s1295_s1 = scalar_lea.vmem %s23_s17, 128  ;;  %p1300_p0 = scmp.lt.s32.totalorder %s23_s17, %s23_s17 }
  0x3d   :  { %p1296_p13 = scmp.ne.s32.totalorder %s23_s17, %s1295_s1  ;;  %p1301_p1 = scmp.lt.s32.totalorder %s1295_s1, %s1295_s1 }
  0x3f   :  { %p1302_p2 = por %p1301_p1, %p1300_p0 }
  0x41   :  { %p1303_p3 = pnand %p1302_p2, %p1296_p13 }
  0x43   :  { %1306 = shalt.err (!%p1303_p3)
}
  0x44   :  { %s1411_s5 = smov 64   ;;  %s1412_s11 = smov 4  }
  0x45   :  { %28 = dma.hbm_to_vmem [thread:$0]  %s1823_s0, 128, %s23_s17, [#allocation3], %s1411_s5, %s1411_s5, %s1412_s11  }
  0x46   :  { %s1413_s25 = smov [#allocation7]   ;;  %s1414_s28 = smov [#allocation10]  }
  0x47   :  { %s47_s27 = sshll.u32 %s1413_s25, 4  ;;  %s69_s29 = sshll.u32 %s1414_s28, 4  ;;  %s48_s27 = int_to_ptr.vmem [resolvable:$true] %s47_s27  ;;  %s70_s29 = int_to_ptr.vmem [resolvable:$true] %s69_s29 }
  0x48   :  { %s1307_s9 = scalar_lea.hbm %s1825_s2, 32 }
  0x49   :  { %p1308_p4 = scmp.ne.s32.totalorder %s1825_s2, %s1307_s9  ;;  %p1311_p5 = scmp.lt.u32.totalorder %s1307_s9, %s1825_s2 }
  0x4b   :  { %p1313_p6 = pnand %p1311_p5, %p1308_p4 }
  0x4d   :  { %1316 = shalt.err (!%p1313_p6)
}
  0x4e   :  { %s1317_s0 = scalar_lea.vmem %s48_s27, 32  ;;  %p1322_p8 = scmp.lt.s32.totalorder %s48_s27, %s48_s27 }
  0x4f   :  { %p1318_p7 = scmp.ne.s32.totalorder %s48_s27, %s1317_s0  ;;  %p1323_p9 = scmp.lt.s32.totalorder %s1317_s0, %s1317_s0 }
  0x51   :  { %p1324_p10 = por %p1323_p9, %p1322_p8 }
  0x53   :  { %p1325_p11 = pnand %p1324_p10, %p1318_p7 }
  0x55   :  { %1328 = shalt.err (!%p1325_p11)
}
  0x56   :  { %50 = dma.hbm_to_vmem [thread:$0]  %s1825_s2, 32, %s48_s27, [#allocation6]  }
  0x57   :  { %s1329_s20 = scalar_lea.hbm %s1827_s4, 32 }
  0x58   :  { %p1330_p12 = scmp.ne.s32.totalorder %s1827_s4, %s1329_s20  ;;  %p1333_p13 = scmp.lt.u32.totalorder %s1329_s20, %s1827_s4 }
  0x5a   :  { %p1335_p0 = pnand %p1333_p13, %p1330_p12 }
  0x5c   :  { %1338 = shalt.err (!%p1335_p0)
}
  0x5d   :  { %s1339_s26 = scalar_lea.vmem %s70_s29, 32  ;;  %p1344_p2 = scmp.lt.s32.totalorder %s70_s29, %s70_s29 }
  0x5e   :  { %p1340_p1 = scmp.ne.s32.totalorder %s70_s29, %s1339_s26  ;;  %p1345_p3 = scmp.lt.s32.totalorder %s1339_s26, %s1339_s26 }
  0x60   :  { %p1346_p4 = por %p1345_p3, %p1344_p2 }
  0x62   :  { %p1347_p5 = pnand %p1346_p4, %p1340_p1 }
  0x64   :  { %1350 = shalt.err (!%p1347_p5)
}
  0x65   :  { %72 = dma.hbm_to_vmem [thread:$0]  %s1827_s4, 32, %s70_s29, [#allocation9]  }
  0x66   :  { %s1415_s5 = smov [#allocation13]   ;;  %s1351_s25 = scalar_lea.hbm %s1829_s6, 32 }
  0x67   :  { %s91_s11 = sshll.u32 %s1415_s5, 4  ;;  %p1352_p6 = scmp.ne.s32.totalorder %s1829_s6, %s1351_s25  ;;  %s92_s11 = int_to_ptr.vmem [resolvable:$true] %s91_s11 }
  0x68   :  { %p1355_p7 = scmp.lt.u32.totalorder %s1351_s25, %s1829_s6 }
  0x6a   :  { %p1357_p8 = pnand %p1355_p7, %p1352_p6 }
  0x6c   :  { %1360 = shalt.err (!%p1357_p8)
}
  0x6d   :  { %s1361_s9 = scalar_lea.vmem %s92_s11, 32  ;;  %p1366_p10 = scmp.lt.s32.totalorder %s92_s11, %s92_s11 }
  0x6e   :  { %p1362_p9 = scmp.ne.s32.totalorder %s92_s11, %s1361_s9  ;;  %p1367_p11 = scmp.lt.s32.totalorder %s1361_s9, %s1361_s9 }
  0x70   :  { %p1368_p12 = por %p1367_p11, %p1366_p10 }
  0x72   :  { %p1369_p13 = pnand %p1368_p12, %p1362_p9 }
  0x74   :  { %1372 = shalt.err (!%p1369_p13)
}
  0x75   :  { %94 = dma.hbm_to_vmem [thread:$0]  %s1829_s6, 32, %s92_s11, [#allocation12]  }
  0x76   :  { %1395 = dma.done.wait [#allocation3], 128  }
  0x77   :  { %1396 = vsyncadd [#allocation3], 4294967168 }
  0x78   :  { %1397 = dma.done.wait [#allocation6], 2080  }
  0x79   :  { %1398 = vsyncadd [#allocation6], 4294965216 }
  0x7a   :  { %1399 = dma.done.wait [#allocation9], 4128  }
  0x7b   :  { %1400 = vsyncadd [#allocation9], 4294963168 }
  0x7c   :  { %1401 = dma.done.wait [#allocation12], 4128  }
  0x7d   :  { %1402 = vsyncadd [#allocation12], 4294963168  ;;  %v1416_v0 = vmov 0   ;;  %v1098_v1 = vld [vmem:[#allocation5 + $0x4] ss:$8 sps:$4 sm:$0xff]   ;;  %v1122_v27 = vld [vmem:[#allocation2] sm:$0xff]   ;;  %v137_v50 = vlaneseq }
  0x7e   :  { %265 = vmatprep.mubr.bf16.mxu0 %v1416_v0  ;;  %v1100_v2 = vld [vmem:[#allocation5] ss:$8 sps:$4 sm:$0xff]   ;;  %233 = vmatprep.subr.bf16.mxu0 %v1098_v1  ;;  %v1101_v3 = vld [vmem:[#allocation5 + $0x14] ss:$8 sps:$4 sm:$0xff]   ;;  %v1103_v4 = vld [vmem:[#allocation5 + $0x10] ss:$8 sps:$4 sm:$0xff]  }
  0x7f   :  { %234 = vmatpush1.bf16.msra.mxu0 %v1100_v2  ;;  %v1104_v5 = vld [vmem:[#allocation5 + $0x24] ss:$8 sps:$4 sm:$0xff]   ;;  %v1106_v6 = vld [vmem:[#allocation5 + $0x20] ss:$8 sps:$4 sm:$0xff]   ;;  %v1107_v7 = vld [vmem:[#allocation5 + $0x34] ss:$8 sps:$4 sm:$0xff]  }
  0x80   :  { %235 = vmatprep.subr.bf16.mxu0 %v1101_v3  ;;  %v1109_v8 = vld [vmem:[#allocation5 + $0x30] ss:$8 sps:$4 sm:$0xff]   ;;  %v1110_v9 = vld [vmem:[#allocation5 + $0x44] ss:$8 sps:$4 sm:$0xff]   ;;  %v1112_v13 = vld [vmem:[#allocation5 + $0x40] ss:$8 sps:$4 sm:$0xff]  }
  0x81   :  { %v1553_v10 = vld [vmem:[#allocation8 + $0x4] ss:$8 sps:$4 sm:$0xff]   ;;  %v1555_v11 = vld [vmem:[#allocation8] ss:$8 sps:$4 sm:$0xff]   ;;  %v1557_v12 = vld [vmem:[#allocation8 + $0x14] ss:$8 sps:$4 sm:$0xff]  }
  0x82   :  { %486 = vmatprep.subr.bf16.mxu1 %v1553_v10  ;;  %v1561_v14 = vld [vmem:[#allocation8 + $0x10] ss:$8 sps:$4 sm:$0xff]   ;;  %v1564_v16 = vld [vmem:[#allocation8 + $0x24] ss:$8 sps:$4 sm:$0xff]   ;;  %v1567_v18 = vld [vmem:[#allocation8 + $0x20] ss:$8 sps:$4 sm:$0xff]  }
  0x83   :  { %236 = vmatpush1.bf16.msra.mxu0 %v1103_v4  ;;  %487 = vmatpush1.bf16.msra.mxu1 %v1555_v11  ;;  %v1113_v15 = vld [vmem:[#allocation5 + $0x54] ss:$8 sps:$4 sm:$0xff]   ;;  %v1115_v17 = vld [vmem:[#allocation5 + $0x50] ss:$8 sps:$4 sm:$0xff]   ;;  %v1116_v19 = vld [vmem:[#allocation5 + $0x64] ss:$8 sps:$4 sm:$0xff]  }
  0x84   :  { %237 = vmatprep.subr.bf16.mxu0 %v1104_v5  ;;  %488 = vmatprep.subr.bf16.mxu1 %v1557_v12  ;;  %v1570_v20 = vld [vmem:[#allocation8 + $0x34] ss:$8 sps:$4 sm:$0xff]   ;;  %v1573_v22 = vld [vmem:[#allocation8 + $0x30] ss:$8 sps:$4 sm:$0xff]   ;;  %v1576_v24 = vld [vmem:[#allocation8 + $0x44] ss:$8 sps:$4 sm:$0xff]  }
  0x85   :  { %v1118_v21 = vld [vmem:[#allocation5 + $0x60] ss:$8 sps:$4 sm:$0xff]   ;;  %v1119_v23 = vld [vmem:[#allocation5 + $0x74] ss:$8 sps:$4 sm:$0xff]   ;;  %v1121_v25 = vld [vmem:[#allocation5 + $0x70] ss:$8 sps:$4 sm:$0xff]  }
  0x86   :  { %v1579_v26 = vld [vmem:[#allocation8 + $0x40] ss:$8 sps:$4 sm:$0xff]   ;;  %v1582_v28 = vld [vmem:[#allocation8 + $0x54] ss:$8 sps:$4 sm:$0xff]   ;;  %v1584_v29 = vld [vmem:[#allocation8 + $0x50] ss:$8 sps:$4 sm:$0xff]  }
  0x87   :  { %238 = vmatpush1.bf16.msra.mxu0 %v1106_v6  ;;  %489 = vmatpush1.bf16.msra.mxu1 %v1561_v14  ;;  %v1586_v30 = vld [vmem:[#allocation8 + $0x64] ss:$8 sps:$4 sm:$0xff]   ;;  %v1591_v31 = vld [vmem:[#allocation8 + $0x60] ss:$8 sps:$4 sm:$0xff]   ;;  %v1593_v32 = vld [vmem:[#allocation8 + $0x74] ss:$8 sps:$4 sm:$0xff]  }
  0x88   :  { %239 = vmatprep.subr.bf16.mxu0 %v1107_v7  ;;  %490 = vmatprep.subr.bf16.mxu1 %v1564_v16  ;;  %v1599_v33 = vld [vmem:[#allocation8 + $0x70] ss:$8 sps:$4 sm:$0xff]   ;;  %v1601_v34 = vld [vmem:[#allocation8 + $0x84] ss:$8 sps:$4 sm:$0xff]   ;;  %v1608_v35 = vld [vmem:[#allocation8 + $0x80] ss:$8 sps:$4 sm:$0xff]  }
  0x89   :  { %v1612_v36 = vld [vmem:[#allocation8 + $0x94] ss:$8 sps:$4 sm:$0xff]   ;;  %v1616_v37 = vld [vmem:[#allocation8 + $0x90] ss:$8 sps:$4 sm:$0xff]   ;;  %v1620_v38 = vld [vmem:[#allocation8 + $0xa4] ss:$8 sps:$4 sm:$0xff]  }
  0x8a   :  { %v1624_v39 = vld [vmem:[#allocation8 + $0xa0] ss:$8 sps:$4 sm:$0xff]   ;;  %v1628_v40 = vld [vmem:[#allocation8 + $0xb4] ss:$8 sps:$4 sm:$0xff]   ;;  %v1632_v41 = vld [vmem:[#allocation8 + $0xb0] ss:$8 sps:$4 sm:$0xff]  }
  0x8b   :  { %240 = vmatpush1.bf16.msra.mxu0 %v1109_v8  ;;  %491 = vmatpush1.bf16.msra.mxu1 %v1567_v18  ;;  %v1636_v42 = vld [vmem:[#allocation8 + $0xc4] ss:$8 sps:$4 sm:$0xff]   ;;  %v1640_v43 = vld [vmem:[#allocation8 + $0xc0] ss:$8 sps:$4 sm:$0xff]   ;;  %v1644_v44 = vld [vmem:[#allocation8 + $0xd4] ss:$8 sps:$4 sm:$0xff]  }
  0x8c   :  { %241 = vmatprep.subr.bf16.mxu0 %v1110_v9  ;;  %492 = vmatprep.subr.bf16.mxu1 %v1570_v20  ;;  %v1661_v45 = vld [vmem:[#allocation8 + $0xd0] ss:$8 sps:$4 sm:$0xff]   ;;  %v1665_v46 = vld [vmem:[#allocation8 + $0xe4] ss:$8 sps:$4 sm:$0xff]   ;;  %v1667_v47 = vld [vmem:[#allocation8 + $0xe0] ss:$8 sps:$4 sm:$0xff]  }
  0x8d   :  { %v1673_v48 = vld [vmem:[#allocation8 + $0xf4] ss:$8 sps:$4 sm:$0xff]   ;;  %v1675_v49 = vld [vmem:[#allocation8 + $0xf0] ss:$8 sps:$4 sm:$0xff]   ;;  %v138_v51 = vshrl.u32 %v137_v50, 7  ;;  %s1417_s6 = smov [#allocation14]  }
  0x8e   :  { %v135_v53 = vld [vmem:[#allocation7] sm:$0x3]  ;;  %v312_v7 = vld [vmem:[#allocation10] sm:$0x3]  ;;  %s987_s10 = sshll.u32 %s1417_s6, 4  ;;  %s988_s10 = int_to_ptr.vmem [resolvable:$true] %s987_s10 }
  0x8f   :  { %242 = vmatpush1.bf16.msra.mxu0 %v1112_v13  ;;  %493 = vmatpush1.bf16.msra.mxu1 %v1573_v22  ;;  %v1683_v52 = vsub.s32 0, %v138_v51  ;;  %v1685_v54 = vsub.s32 1, %v138_v51  ;;  %s1373_s13 = scalar_lea.vmem %s988_s10, 512  ;;  %p1378_p1 = scmp.lt.s32.totalorder %s988_s10, %s988_s10 }
  0x90   :  { %243 = vmatprep.subr.bf16.mxu0 %v1113_v15  ;;  %494 = vmatprep.subr.bf16.mxu1 %v1576_v24  ;;  %p1374_p0 = scmp.ne.s32.totalorder %s988_s10, %s1373_s13  ;;  %p1379_p2 = scmp.lt.s32.totalorder %s1373_s13, %s1373_s13 }
  0x91   :  { %v140_v55 = vrot.slane %v135_v53, %v1683_v52  ;;  %v144_v56 = vrot.slane %v135_v53, %v1685_v54  ;;  %v1722_v8 = vrot.slane %v312_v7, %v1683_v52  ;;  %v1725_v9 = vrot.slane %v312_v7, %v1685_v54  ;;  %v1195_v7 = vld [vmem:[#allocation11 + $0x80] ss:$8 sps:$4 sm:$0xff]  }
  0x92   :  { %p1380_p3 = por %p1379_p2, %p1378_p1 }
  0x93   :  { %244 = vmatpush1.bf16.msra.mxu0 %v1115_v17  ;;  %495 = vmatpush1.bf16.msra.mxu1 %v1579_v26 }
  0x94   :  { %245 = vmatprep.subr.bf16.mxu0 %v1116_v19  ;;  %496 = vmatprep.subr.bf16.mxu1 %v1582_v28  ;;  %p1381_p4 = pnand %p1380_p3, %p1374_p0 }
  0x97   :  { %246 = vmatpush1.bf16.msra.mxu0 %v1118_v21  ;;  %497 = vmatpush1.bf16.msra.mxu1 %v1584_v29 }
  0x98   :  { %247 = vmatprep.subr.bf16.mxu0 %v1119_v23  ;;  %498 = vmatprep.subr.bf16.mxu1 %v1586_v30 }
  0x9b   :  { %248 = vmatpush1.bf16.msra.mxu0 %v1121_v25  ;;  %499 = vmatpush1.bf16.msra.mxu1 %v1591_v31 }
  0x9c   :  { %535 = vmatprep.subr.bf16.mxu0 %v1553_v10  ;;  %500 = vmatprep.subr.bf16.mxu1 %v1593_v32 }
  0x9e   :  { %266 = vmatmul.mubr.bf16.vlgmr.msra.gmra.mrb[0].mxu0 %v1122_v27 }
  0x9f   :  { %536 = vmatpush1.bf16.msra.mxu0 %v1555_v11  ;;  %501 = vmatpush1.bf16.msra.mxu1 %v1599_v33 }
  0xa0   :  { %537 = vmatprep.subr.bf16.mxu0 %v1557_v12  ;;  %502 = vmatprep.subr.bf16.mxu1 %v1601_v34 }
  0xa3   :  { %538 = vmatpush1.bf16.msra.mxu0 %v1561_v14  ;;  %503 = vmatpush1.bf16.msra.mxu1 %v1608_v35 }
  0xa4   :  { %539 = vmatprep.subr.bf16.mxu0 %v1564_v16  ;;  %504 = vmatprep.subr.bf16.mxu1 %v1612_v36 }
  0xa7   :  { %540 = vmatpush1.bf16.msra.mxu0 %v1567_v18  ;;  %505 = vmatpush1.bf16.msra.mxu1 %v1616_v37 }
  0xa8   :  { %541 = vmatprep.subr.bf16.mxu0 %v1570_v20  ;;  %506 = vmatprep.subr.bf16.mxu1 %v1620_v38 }
  0xab   :  { %542 = vmatpush1.bf16.msra.mxu0 %v1573_v22  ;;  %507 = vmatpush1.bf16.msra.mxu1 %v1624_v39 }
  0xac   :  { %543 = vmatprep.subr.bf16.mxu0 %v1576_v24  ;;  %508 = vmatprep.subr.bf16.mxu1 %v1628_v40 }
  0xaf   :  { %544 = vmatpush1.bf16.msra.mxu0 %v1579_v26  ;;  %509 = vmatpush1.bf16.msra.mxu1 %v1632_v41 }
  0xb0   :  { %545 = vmatprep.subr.bf16.mxu0 %v1582_v28  ;;  %510 = vmatprep.subr.bf16.mxu1 %v1636_v42 }
  0xb3   :  { %546 = vmatpush1.bf16.msra.mxu0 %v1584_v29  ;;  %511 = vmatpush1.bf16.msra.mxu1 %v1640_v43 }
  0xb4   :  { %547 = vmatprep.subr.bf16.mxu0 %v1586_v30  ;;  %512 = vmatprep.subr.bf16.mxu1 %v1644_v44 }
  0xb7   :  { %548 = vmatpush1.bf16.msra.mxu0 %v1591_v31  ;;  %513 = vmatpush1.bf16.msra.mxu1 %v1661_v45 }
  0xb8   :  { %549 = vmatprep.subr.bf16.mxu0 %v1593_v32  ;;  %514 = vmatprep.subr.bf16.mxu1 %v1665_v46 }
  0xbb   :  { %550 = vmatpush1.bf16.msra.mxu0 %v1599_v33  ;;  %515 = vmatpush1.bf16.msra.mxu1 %v1667_v47 }
  0xbc   :  { %551 = vmatprep.subr.bf16.mxu0 %v1601_v34  ;;  %516 = vmatprep.subr.bf16.mxu1 %v1673_v48 }
  0xbf   :  { %552 = vmatpush1.bf16.msra.mxu0 %v1608_v35  ;;  %517 = vmatpush1.bf16.msra.mxu1 %v1675_v49 }
  0xc0   :  { %553 = vmatprep.subr.bf16.mxu0 %v1612_v36  ;;  %584 = vmatprep.subr.bf16.mxu1 %v1553_v10 }
  0xc3   :  { %554 = vmatpush1.bf16.msra.mxu0 %v1616_v37 }
  0xc4   :  { %555 = vmatprep.subr.bf16.mxu0 %v1620_v38 }
  0xc7   :  { %556 = vmatpush1.bf16.msra.mxu0 %v1624_v39 }
  0xc8   :  { %557 = vmatprep.subr.bf16.mxu0 %v1628_v40 }
  0xcb   :  { %558 = vmatpush1.bf16.msra.mxu0 %v1632_v41 }
  0xcc   :  { %559 = vmatprep.subr.bf16.mxu0 %v1636_v42 }
  0xcf   :  { %560 = vmatpush1.bf16.msra.mxu0 %v1640_v43 }
  0xd0   :  { %561 = vmatprep.subr.bf16.mxu0 %v1644_v44 }
  0xd3   :  { %562 = vmatpush1.bf16.msra.mxu0 %v1661_v45 }
  0xd4   :  { %563 = vmatprep.subr.bf16.mxu0 %v1665_v46 }
  0xd7   :  { %564 = vmatpush1.bf16.msra.mxu0 %v1667_v47 }
  0xd8   :  { %565 = vmatprep.subr.bf16.mxu0 %v1673_v48 }
  0xdb   :  { %566 = vmatpush1.bf16.msra.mxu0 %v1675_v49 }
  0xdc   :  { %633 = vmatprep.subr.bf16.mxu0 %v1553_v10 }
 0x171   :  { %v267_v57 = vpop.f32.mrb[0].mxu0 }
 0x172   :  { %v268_v58 = vadd.f32 %v267_v57, %v140_v55  ;;  %v269_v59 = vpop.f32.mrb[1].mxu0 }
 0x173   :  { %v270_v60 = vadd.f32 %v269_v59, %v144_v56  ;;  %v271_v61 = vpop.f32.mrb[2].mxu0 }
 0x174   :  { %v272_v62 = vadd.f32 %v271_v61, %v140_v55  ;;  %v273_v63 = vpop.f32.mrb[3].mxu0  ;;  %v276_v1 = vmax.f32 %v268_v58, 0.0 }
 0x175   :  { %v274_v0 = vadd.f32 %v273_v63, %v144_v56  ;;  %v277_v3 = vmax.f32 %v270_v60, 0.0 }
 0x176   :  { %v278_v2 = vmax.f32 %v272_v62, 0.0 }
 0x177   :  { %v279_v4 = vmax.f32 %v274_v0, 0.0 }
 0x178   :  { %v324_v5 = vpack.c.bf16 %v278_v2, %v276_v1 }
 0x179   :  { %v325_v6 = vpack.c.bf16 %v279_v4, %v277_v3 }
 0x17b   :  { %518 = vmatprep.mubr.bf16.mxu1 %v325_v6 }
 0x17c   :  { %519 = vmatmul.mubr.bf16.vlgmr.msra.gmra.mrb[0].mxu1 %v324_v5 }
 0x17d   :  { %585 = vmatpush1.bf16.msra.mxu1 %v1555_v11 }
 0x17e   :  { %586 = vmatprep.subr.bf16.mxu1 %v1557_v12 }
 0x181   :  { %587 = vmatpush1.bf16.msra.mxu1 %v1561_v14 }
 0x182   :  { %588 = vmatprep.subr.bf16.mxu1 %v1564_v16 }
 0x185   :  { %589 = vmatpush1.bf16.msra.mxu1 %v1567_v18 }
 0x186   :  { %590 = vmatprep.subr.bf16.mxu1 %v1570_v20 }
 0x189   :  { %591 = vmatpush1.bf16.msra.mxu1 %v1573_v22 }
 0x18a   :  { %592 = vmatprep.subr.bf16.mxu1 %v1576_v24 }
 0x18d   :  { %593 = vmatpush1.bf16.msra.mxu1 %v1579_v26 }
 0x18e   :  { %594 = vmatprep.subr.bf16.mxu1 %v1582_v28 }
 0x191   :  { %595 = vmatpush1.bf16.msra.mxu1 %v1584_v29 }
 0x192   :  { %596 = vmatprep.subr.bf16.mxu1 %v1586_v30 }
 0x195   :  { %597 = vmatpush1.bf16.msra.mxu1 %v1591_v31 }
 0x196   :  { %598 = vmatprep.subr.bf16.mxu1 %v1593_v32 }
 0x199   :  { %599 = vmatpush1.bf16.msra.mxu1 %v1599_v33 }
 0x19a   :  { %600 = vmatprep.subr.bf16.mxu1 %v1601_v34 }
 0x19d   :  { %601 = vmatpush1.bf16.msra.mxu1 %v1608_v35 }
 0x19e   :  { %602 = vmatprep.subr.bf16.mxu1 %v1612_v36 }
 0x1a1   :  { %603 = vmatpush1.bf16.msra.mxu1 %v1616_v37 }
 0x1a2   :  { %604 = vmatprep.subr.bf16.mxu1 %v1620_v38 }
 0x1a5   :  { %605 = vmatpush1.bf16.msra.mxu1 %v1624_v39 }
 0x1a6   :  { %606 = vmatprep.subr.bf16.mxu1 %v1628_v40 }
 0x1a9   :  { %607 = vmatpush1.bf16.msra.mxu1 %v1632_v41 }
 0x1aa   :  { %608 = vmatprep.subr.bf16.mxu1 %v1636_v42 }
 0x1ad   :  { %609 = vmatpush1.bf16.msra.mxu1 %v1640_v43 }
 0x1ae   :  { %610 = vmatprep.subr.bf16.mxu1 %v1644_v44 }
 0x1b1   :  { %611 = vmatpush1.bf16.msra.mxu1 %v1661_v45 }
 0x1b2   :  { %612 = vmatprep.subr.bf16.mxu1 %v1665_v46 }
 0x1b5   :  { %613 = vmatpush1.bf16.msra.mxu1 %v1667_v47 }
 0x1b6   :  { %614 = vmatprep.subr.bf16.mxu1 %v1673_v48 }
 0x1b9   :  { %615 = vmatpush1.bf16.msra.mxu1 %v1675_v49 }
 0x1ba   :  { %682 = vmatprep.subr.bf16.mxu1 %v1553_v10 }
 0x24f   :  { %v520_v13 = vpop.f32.mrb[0].mxu1 }
 0x250   :  { %v521_v15 = vadd.f32 %v520_v13, %v1722_v8  ;;  %v522_v17 = vpop.f32.mrb[1].mxu1  ;;  %v1200_v13 = vld [vmem:[#allocation11 + $0x94] ss:$8 sps:$4 sm:$0xff]  }
 0x251   :  { %v523_v19 = vadd.f32 %v522_v17, %v1725_v9  ;;  %v524_v21 = vpop.f32.mrb[2].mxu1  ;;  %v1203_v17 = vld [vmem:[#allocation11 + $0xa4] ss:$8 sps:$4 sm:$0xff]  }
 0x252   :  { %v525_v23 = vadd.f32 %v524_v21, %v1722_v8  ;;  %v526_v25 = vpop.f32.mrb[3].mxu1  ;;  %v529_v10 = vmax.f32 %v521_v15, 0.0  ;;  %v1198_v15 = vld [vmem:[#allocation11 + $0x90] ss:$8 sps:$4 sm:$0xff]   ;;  %v1206_v21 = vld [vmem:[#allocation11 + $0xb4] ss:$8 sps:$4 sm:$0xff]  }
 0x253   :  { %v527_v27 = vadd.f32 %v526_v25, %v1725_v9  ;;  %v530_v51 = vmax.f32 %v523_v19, 0.0  ;;  %v1201_v19 = vld [vmem:[#allocation11 + $0xa0] ss:$8 sps:$4 sm:$0xff]   ;;  %v1209_v25 = vld [vmem:[#allocation11 + $0xc4] ss:$8 sps:$4 sm:$0xff]  }
 0x254   :  { %v531_v50 = vmax.f32 %v525_v23, 0.0  ;;  %v1204_v23 = vld [vmem:[#allocation11 + $0xb0] ss:$8 sps:$4 sm:$0xff]  }
 0x255   :  { %v532_v53 = vmax.f32 %v527_v27, 0.0  ;;  %v1207_v27 = vld [vmem:[#allocation11 + $0xc0] ss:$8 sps:$4 sm:$0xff]  }
 0x256   :  { %v533_v55 = vpack.c.bf16 %v531_v50, %v529_v10  ;;  %v1212_v10 = vld [vmem:[#allocation11 + $0xd4] ss:$8 sps:$4 sm:$0xff]   ;;  %v1210_v50 = vld [vmem:[#allocation11 + $0xd0] ss:$8 sps:$4 sm:$0xff]  }
 0x257   :  { %v534_v56 = vpack.c.bf16 %v532_v53, %v530_v51 }
 0x259   :  { %567 = vmatprep.mubr.bf16.mxu0 %v534_v56 }
 0x25a   :  { %568 = vmatmul.mubr.bf16.vlgmr.msra.gmra.mrb[4].mxu0 %v533_v55 }
 0x25b   :  { %634 = vmatpush1.bf16.msra.mxu0 %v1555_v11 }
 0x25c   :  { %635 = vmatprep.subr.bf16.mxu0 %v1557_v12 }
 0x25f   :  { %636 = vmatpush1.bf16.msra.mxu0 %v1561_v14 }
 0x260   :  { %637 = vmatprep.subr.bf16.mxu0 %v1564_v16 }
 0x263   :  { %638 = vmatpush1.bf16.msra.mxu0 %v1567_v18 }
 0x264   :  { %639 = vmatprep.subr.bf16.mxu0 %v1570_v20 }
 0x267   :  { %640 = vmatpush1.bf16.msra.mxu0 %v1573_v22 }
 0x268   :  { %641 = vmatprep.subr.bf16.mxu0 %v1576_v24 }
 0x26b   :  { %642 = vmatpush1.bf16.msra.mxu0 %v1579_v26 }
 0x26c   :  { %643 = vmatprep.subr.bf16.mxu0 %v1582_v28 }
 0x26f   :  { %644 = vmatpush1.bf16.msra.mxu0 %v1584_v29 }
 0x270   :  { %645 = vmatprep.subr.bf16.mxu0 %v1586_v30 }
 0x273   :  { %646 = vmatpush1.bf16.msra.mxu0 %v1591_v31 }
 0x274   :  { %647 = vmatprep.subr.bf16.mxu0 %v1593_v32 }
 0x277   :  { %648 = vmatpush1.bf16.msra.mxu0 %v1599_v33 }
 0x278   :  { %649 = vmatprep.subr.bf16.mxu0 %v1601_v34 }
 0x27b   :  { %650 = vmatpush1.bf16.msra.mxu0 %v1608_v35 }
 0x27c   :  { %651 = vmatprep.subr.bf16.mxu0 %v1612_v36 }
 0x27f   :  { %652 = vmatpush1.bf16.msra.mxu0 %v1616_v37 }
 0x280   :  { %653 = vmatprep.subr.bf16.mxu0 %v1620_v38 }
 0x283   :  { %654 = vmatpush1.bf16.msra.mxu0 %v1624_v39 }
 0x284   :  { %655 = vmatprep.subr.bf16.mxu0 %v1628_v40 }
 0x287   :  { %656 = vmatpush1.bf16.msra.mxu0 %v1632_v41 }
 0x288   :  { %657 = vmatprep.subr.bf16.mxu0 %v1636_v42 }
 0x28b   :  { %658 = vmatpush1.bf16.msra.mxu0 %v1640_v43 }
 0x28c   :  { %659 = vmatprep.subr.bf16.mxu0 %v1644_v44 }
 0x28f   :  { %660 = vmatpush1.bf16.msra.mxu0 %v1661_v45 }
 0x290   :  { %661 = vmatprep.subr.bf16.mxu0 %v1665_v46 }
 0x293   :  { %662 = vmatpush1.bf16.msra.mxu0 %v1667_v47 }
 0x294   :  { %663 = vmatprep.subr.bf16.mxu0 %v1673_v48 }
 0x297   :  { %664 = vmatpush1.bf16.msra.mxu0 %v1675_v49 }
 0x32d   :  { %v569_v57 = vpop.f32.mrb[4].mxu0 }
 0x32e   :  { %v570_v58 = vadd.f32 %v569_v57, %v1722_v8  ;;  %v571_v59 = vpop.f32.mrb[5].mxu0 }
 0x32f   :  { %v572_v60 = vadd.f32 %v571_v59, %v1725_v9  ;;  %v573_v61 = vpop.f32.mrb[6].mxu0 }
 0x330   :  { %v574_v62 = vadd.f32 %v573_v61, %v1722_v8  ;;  %v575_v63 = vpop.f32.mrb[7].mxu0  ;;  %v578_v1 = vmax.f32 %v570_v58, 0.0 }
 0x331   :  { %v576_v0 = vadd.f32 %v575_v63, %v1725_v9  ;;  %v579_v3 = vmax.f32 %v572_v60, 0.0 }
 0x332   :  { %v580_v2 = vmax.f32 %v574_v62, 0.0 }
 0x333   :  { %v581_v4 = vmax.f32 %v576_v0, 0.0 }
 0x334   :  { %v582_v5 = vpack.c.bf16 %v580_v2, %v578_v1 }
 0x335   :  { %v583_v6 = vpack.c.bf16 %v581_v4, %v579_v3  ;;  %v1215_v3 = vld [vmem:[#allocation11 + $0xe4] ss:$8 sps:$4 sm:$0xff]   ;;  %v1213_v4 = vld [vmem:[#allocation11 + $0xe0] ss:$8 sps:$4 sm:$0xff]  }
 0x337   :  { %616 = vmatprep.mubr.bf16.mxu1 %v583_v6  ;;  %v1216_v6 = vld [vmem:[#allocation11 + $0xf0] ss:$8 sps:$4 sm:$0xff]  }
 0x338   :  { %617 = vmatmul.mubr.bf16.vlgmr.msra.gmra.mrb[4].mxu1 %v582_v5  ;;  %v1218_v5 = vld [vmem:[#allocation11 + $0xf4] ss:$8 sps:$4 sm:$0xff]  }
 0x339   :  { %683 = vmatpush1.bf16.msra.mxu1 %v1555_v11 }
 0x33a   :  { %684 = vmatprep.subr.bf16.mxu1 %v1557_v12 }
 0x33d   :  { %685 = vmatpush1.bf16.msra.mxu1 %v1561_v14 }
 0x33e   :  { %686 = vmatprep.subr.bf16.mxu1 %v1564_v16 }
 0x341   :  { %687 = vmatpush1.bf16.msra.mxu1 %v1567_v18 }
 0x342   :  { %688 = vmatprep.subr.bf16.mxu1 %v1570_v20 }
 0x345   :  { %689 = vmatpush1.bf16.msra.mxu1 %v1573_v22 }
 0x346   :  { %690 = vmatprep.subr.bf16.mxu1 %v1576_v24 }
 0x349   :  { %691 = vmatpush1.bf16.msra.mxu1 %v1579_v26 }
 0x34a   :  { %692 = vmatprep.subr.bf16.mxu1 %v1582_v28 }
 0x34d   :  { %693 = vmatpush1.bf16.msra.mxu1 %v1584_v29 }
 0x34e   :  { %694 = vmatprep.subr.bf16.mxu1 %v1586_v30 }
 0x351   :  { %695 = vmatpush1.bf16.msra.mxu1 %v1591_v31 }
 0x352   :  { %696 = vmatprep.subr.bf16.mxu1 %v1593_v32 }
 0x355   :  { %697 = vmatpush1.bf16.msra.mxu1 %v1599_v33  ;;  %v1171_v33 = vld [vmem:[#allocation11] ss:$8 sps:$4 sm:$0xff]  }
 0x356   :  { %698 = vmatprep.subr.bf16.mxu1 %v1601_v34  ;;  %v1173_v34 = vld [vmem:[#allocation11 + $0x4] ss:$8 sps:$4 sm:$0xff]  }
 0x357   :  { %935 = vmatprep.subr.bf16.mxu0 %v1173_v34 }
 0x359   :  { %699 = vmatpush1.bf16.msra.mxu1 %v1608_v35  ;;  %v1176_v35 = vld [vmem:[#allocation11 + $0x14] ss:$8 sps:$4 sm:$0xff]  }
 0x35a   :  { %700 = vmatprep.subr.bf16.mxu1 %v1612_v36  ;;  %v1174_v36 = vld [vmem:[#allocation11 + $0x10] ss:$8 sps:$4 sm:$0xff]  }
 0x35d   :  { %701 = vmatpush1.bf16.msra.mxu1 %v1616_v37  ;;  %v1179_v37 = vld [vmem:[#allocation11 + $0x24] ss:$8 sps:$4 sm:$0xff]  }
 0x35e   :  { %702 = vmatprep.subr.bf16.mxu1 %v1620_v38  ;;  %v1177_v38 = vld [vmem:[#allocation11 + $0x20] ss:$8 sps:$4 sm:$0xff]  }
 0x361   :  { %703 = vmatpush1.bf16.msra.mxu1 %v1624_v39  ;;  %v1182_v39 = vld [vmem:[#allocation11 + $0x34] ss:$8 sps:$4 sm:$0xff]  }
 0x362   :  { %704 = vmatprep.subr.bf16.mxu1 %v1628_v40  ;;  %v1180_v40 = vld [vmem:[#allocation11 + $0x30] ss:$8 sps:$4 sm:$0xff]  }
 0x365   :  { %705 = vmatpush1.bf16.msra.mxu1 %v1632_v41  ;;  %v1185_v41 = vld [vmem:[#allocation11 + $0x44] ss:$8 sps:$4 sm:$0xff]  }
 0x366   :  { %706 = vmatprep.subr.bf16.mxu1 %v1636_v42  ;;  %v1183_v42 = vld [vmem:[#allocation11 + $0x40] ss:$8 sps:$4 sm:$0xff]  }
 0x369   :  { %707 = vmatpush1.bf16.msra.mxu1 %v1640_v43  ;;  %v1188_v43 = vld [vmem:[#allocation11 + $0x54] ss:$8 sps:$4 sm:$0xff]  }
 0x36a   :  { %708 = vmatprep.subr.bf16.mxu1 %v1644_v44  ;;  %v1186_v44 = vld [vmem:[#allocation11 + $0x50] ss:$8 sps:$4 sm:$0xff]  }
 0x36d   :  { %709 = vmatpush1.bf16.msra.mxu1 %v1661_v45  ;;  %v1191_v45 = vld [vmem:[#allocation11 + $0x64] ss:$8 sps:$4 sm:$0xff]  }
 0x36e   :  { %710 = vmatprep.subr.bf16.mxu1 %v1665_v46  ;;  %v1189_v46 = vld [vmem:[#allocation11 + $0x60] ss:$8 sps:$4 sm:$0xff]  }
 0x371   :  { %711 = vmatpush1.bf16.msra.mxu1 %v1667_v47  ;;  %v1194_v47 = vld [vmem:[#allocation11 + $0x74] ss:$8 sps:$4 sm:$0xff]  }
 0x372   :  { %712 = vmatprep.subr.bf16.mxu1 %v1673_v48  ;;  %v1192_v48 = vld [vmem:[#allocation11 + $0x70] ss:$8 sps:$4 sm:$0xff]  }
 0x375   :  { %713 = vmatpush1.bf16.msra.mxu1 %v1675_v49  ;;  %v1197_v49 = vld [vmem:[#allocation11 + $0x84] ss:$8 sps:$4 sm:$0xff]  }
 0x40b   :  { %v618_v11 = vpop.f32.mrb[4].mxu1 }
 0x40c   :  { %v619_v12 = vadd.f32 %v618_v11, %v1722_v8  ;;  %v620_v14 = vpop.f32.mrb[5].mxu1 }
 0x40d   :  { %v621_v16 = vadd.f32 %v620_v14, %v1725_v9  ;;  %v622_v18 = vpop.f32.mrb[6].mxu1 }
 0x40e   :  { %v623_v20 = vadd.f32 %v622_v18, %v1722_v8  ;;  %v624_v22 = vpop.f32.mrb[7].mxu1  ;;  %v627_v26 = vmax.f32 %v619_v12, 0.0 }
 0x40f   :  { %v625_v24 = vadd.f32 %v624_v22, %v1725_v9  ;;  %v628_v29 = vmax.f32 %v621_v16, 0.0 }
 0x410   :  { %v629_v28 = vmax.f32 %v623_v20, 0.0 }
 0x411   :  { %v630_v30 = vmax.f32 %v625_v24, 0.0 }
 0x412   :  { %v631_v31 = vpack.c.bf16 %v629_v28, %v627_v26 }
 0x413   :  { %v632_v32 = vpack.c.bf16 %v630_v30, %v628_v29 }
 0x415   :  { %665 = vmatprep.mubr.bf16.mxu0 %v632_v32 }
 0x416   :  { %666 = vmatmul.mubr.bf16.vlgmr.msra.gmra.mrb[8].mxu0 %v631_v31 }
 0x417   :  { %936 = vmatpush1.bf16.msra.mxu0 %v1171_v33  ;;  %v763_v33 = vld [vmem:[#allocation13] sm:$0x3] }
 0x418   :  { %937 = vmatprep.subr.bf16.mxu0 %v1176_v35  ;;  %v768_v34 = vrot.slane %v763_v33, %v1683_v52  ;;  %v772_v35 = vrot.slane %v763_v33, %v1685_v54 }
 0x41b   :  { %938 = vmatpush1.bf16.msra.mxu0 %v1174_v36 }
 0x41c   :  { %939 = vmatprep.subr.bf16.mxu0 %v1179_v37 }
 0x41f   :  { %940 = vmatpush1.bf16.msra.mxu0 %v1177_v38 }
 0x420   :  { %941 = vmatprep.subr.bf16.mxu0 %v1182_v39 }
 0x423   :  { %942 = vmatpush1.bf16.msra.mxu0 %v1180_v40 }
 0x424   :  { %943 = vmatprep.subr.bf16.mxu0 %v1185_v41 }
 0x427   :  { %944 = vmatpush1.bf16.msra.mxu0 %v1183_v42 }
 0x428   :  { %945 = vmatprep.subr.bf16.mxu0 %v1188_v43 }
 0x42b   :  { %946 = vmatpush1.bf16.msra.mxu0 %v1186_v44 }
 0x42c   :  { %947 = vmatprep.subr.bf16.mxu0 %v1191_v45 }
 0x42f   :  { %948 = vmatpush1.bf16.msra.mxu0 %v1189_v46 }
 0x430   :  { %949 = vmatprep.subr.bf16.mxu0 %v1194_v47 }
 0x433   :  { %950 = vmatpush1.bf16.msra.mxu0 %v1192_v48 }
 0x434   :  { %951 = vmatprep.subr.bf16.mxu0 %v1197_v49 }
 0x437   :  { %952 = vmatpush1.bf16.msra.mxu0 %v1195_v7 }
 0x438   :  { %953 = vmatprep.subr.bf16.mxu0 %v1200_v13 }
 0x43b   :  { %954 = vmatpush1.bf16.msra.mxu0 %v1198_v15 }
 0x43c   :  { %955 = vmatprep.subr.bf16.mxu0 %v1203_v17 }
 0x43f   :  { %956 = vmatpush1.bf16.msra.mxu0 %v1201_v19 }
 0x440   :  { %957 = vmatprep.subr.bf16.mxu0 %v1206_v21 }
 0x443   :  { %958 = vmatpush1.bf16.msra.mxu0 %v1204_v23 }
 0x444   :  { %959 = vmatprep.subr.bf16.mxu0 %v1209_v25 }
 0x447   :  { %960 = vmatpush1.bf16.msra.mxu0 %v1207_v27 }
 0x448   :  { %961 = vmatprep.subr.bf16.mxu0 %v1212_v10 }
 0x44b   :  { %962 = vmatpush1.bf16.msra.mxu0 %v1210_v50 }
 0x44c   :  { %963 = vmatprep.subr.bf16.mxu0 %v1215_v3 }
 0x44f   :  { %964 = vmatpush1.bf16.msra.mxu0 %v1213_v4 }
 0x450   :  { %965 = vmatprep.subr.bf16.mxu0 %v1218_v5 }
 0x453   :  { %966 = vmatpush1.bf16.msra.mxu0 %v1216_v6 }
 0x4e9   :  { %v667_v51 = vpop.f32.mrb[8].mxu0 }
 0x4ea   :  { %v668_v53 = vadd.f32 %v667_v51, %v1722_v8  ;;  %v669_v55 = vpop.f32.mrb[9].mxu0 }
 0x4eb   :  { %v670_v56 = vadd.f32 %v669_v55, %v1725_v9  ;;  %v671_v57 = vpop.f32.mrb[10].mxu0 }
 0x4ec   :  { %v672_v58 = vadd.f32 %v671_v57, %v1722_v8  ;;  %v673_v59 = vpop.f32.mrb[11].mxu0  ;;  %v676_v61 = vmax.f32 %v668_v53, 0.0 }
 0x4ed   :  { %v674_v60 = vadd.f32 %v673_v59, %v1725_v9  ;;  %v677_v63 = vmax.f32 %v670_v56, 0.0 }
 0x4ee   :  { %v678_v62 = vmax.f32 %v672_v58, 0.0 }
 0x4ef   :  { %v679_v0 = vmax.f32 %v674_v60, 0.0 }
 0x4f0   :  { %v680_v1 = vpack.c.bf16 %v678_v62, %v676_v61 }
 0x4f1   :  { %v681_v2 = vpack.c.bf16 %v679_v0, %v677_v63 }
 0x4f3   :  { %714 = vmatprep.mubr.bf16.mxu1 %v681_v2 }
 0x4f4   :  { %715 = vmatmul.mubr.bf16.vlgmr.msra.gmra.mrb[8].mxu1 %v680_v1 }
 0x5c7   :  { %v716_v11 = vpop.f32.mrb[8].mxu1 }
 0x5c8   :  { %v717_v12 = vadd.f32 %v716_v11, %v1722_v8  ;;  %v718_v14 = vpop.f32.mrb[9].mxu1 }
 0x5c9   :  { %v719_v16 = vadd.f32 %v718_v14, %v1725_v9  ;;  %v720_v18 = vpop.f32.mrb[10].mxu1 }
 0x5ca   :  { %v721_v20 = vadd.f32 %v720_v18, %v1722_v8  ;;  %v722_v22 = vpop.f32.mrb[11].mxu1  ;;  %v725_v26 = vmax.f32 %v717_v12, 0.0 }
 0x5cb   :  { %v723_v24 = vadd.f32 %v722_v22, %v1725_v9  ;;  %v726_v29 = vmax.f32 %v719_v16, 0.0 }
 0x5cc   :  { %v727_v28 = vmax.f32 %v721_v20, 0.0 }
 0x5cd   :  { %v728_v30 = vmax.f32 %v723_v24, 0.0 }
 0x5ce   :  { %v729_v31 = vpack.c.bf16 %v727_v28, %v725_v26 }
 0x5cf   :  { %v730_v32 = vpack.c.bf16 %v728_v30, %v726_v29 }
 0x5d1   :  { %967 = vmatprep.mubr.bf16.mxu0 %v730_v32 }
 0x5d2   :  { %968 = vmatmul.mubr.bf16.vlgmr.msra.gmra.mrb[12].mxu0 %v729_v31 }
 0x6a5   :  { %v969_v36 = vpop.f32.mrb[12].mxu0 }
 0x6a6   :  { %v970_v8 = vadd.f32 %v969_v36, %v768_v34  ;;  %v971_v37 = vpop.f32.mrb[13].mxu0 }
 0x6a7   :  { %v972_v38 = vadd.f32 %v971_v37, %v772_v35  ;;  %v973_v9 = vpop.f32.mrb[14].mxu0 }
 0x6a8   :  { %978 = vst [vmem:[#allocation14] sm:$0xff] %v970_v8  ;;  %v974_v39 = vadd.f32 %v973_v9, %v768_v34  ;;  %v975_v40 = vpop.f32.mrb[15].mxu0 }
 0x6a9   :  { %979 = vst [vmem:[#allocation14 + $0x8] sm:$0xff] %v972_v38  ;;  %v976_v41 = vadd.f32 %v975_v40, %v772_v35 }
 0x6aa   :  { %980 = vst [vmem:[#allocation14 + $0x10] sm:$0xff] %v974_v39 }
 0x6ab   :  { %981 = vst [vmem:[#allocation14 + $0x18] sm:$0xff] %v976_v41 }
 0x6ac   :  { %1384 = shalt.err (!%p1381_p4)
}
 0x6ad   :  { %s1385_s0 = scalar_lea.hbm %s1830_s7, 512 }
 0x6ae   :  { %p1386_p5 = scmp.ne.s32.totalorder %s1830_s7, %s1385_s0  ;;  %p1389_p6 = scmp.lt.u32.totalorder %s1385_s0, %s1830_s7 }
 0x6b0   :  { %p1391_p7 = pnand %p1389_p6, %p1386_p5 }
 0x6b2   :  { %1394 = shalt.err (!%p1391_p7)
}
 0x6b3   :  { %s1418_s20 = smov 256   ;;  %s1419_s21 = smov 16  }
 0x6b4   :  { %993 = dma.vmem_to_hbm [thread:$0]  %s988_s10, 512, %s1830_s7, [#allocation4], %s1418_s20, %s1418_s20, %s1419_s21  }
 0x6b5   :  { %1403 = dma.done.wait [#allocation4], 512  }
 0x6b6   :  { %1404 = vsyncadd [#allocation4], 4294966784 }
 0x6b7   :  { %997 = vsyncpa [#allocation3], 1 }
 0x6b8   :  { %998 = vsyncpa [#allocation6], 1 }
 0x6b9   :  { %999 = vsyncpa [#allocation9], 1 }
 0x6ba   :  { %1000 = vsyncpa [#allocation12], 1 }
 0x6bb   :  { %1001 = vsyncpa [#allocation4], 1 }

</bundles_post_ra>
